<compile_context>
chip_gen: v7x
topology: tpu7x:2x2x1
jax: 0.10.0
libtpu: 0.0.40
codegen_flags: <defaults>
</compile_context>

<pallas_src>
import jax
import jax.numpy as jnp
from jax.experimental import pallas as pl
from jax.experimental.pallas import tpu as pltpu


# ----------------------------------------------------------------------------
# Kernels
# ----------------------------------------------------------------------------
def _kernel_no_context(x_ref, w_ref, b_ref, logits_ref, ctx_ref):
    # x: (C_in, thw)   w: (C_out, C_in)   b: (C_out, 1) f32
    np_ = logits_ref.shape[0]
    acc = jnp.dot(w_ref[...], x_ref[...], preferred_element_type=jnp.float32)
    acc = acc + b_ref[...]
    logits_ref[...] = acc[:np_].astype(logits_ref.dtype)
    ctx_ref[...] = acc[np_:].astype(ctx_ref.dtype)


def _kernel_context_split(xf_ref, xc_ref, wf_ref, wc_ref, b_ref,
                          logits_ref, ctx_ref):
    # Small-channel path: W^T @ [xf; xc] = Wf @ xf + Wc @ xc (no scratch).
    np_ = logits_ref.shape[0]
    acc = jnp.dot(wf_ref[...], xf_ref[...], preferred_element_type=jnp.float32)
    acc = acc + jnp.dot(wc_ref[...], xc_ref[...],
                        preferred_element_type=jnp.float32)
    acc = acc + b_ref[...]
    logits_ref[...] = acc[:np_].astype(logits_ref.dtype)
    ctx_ref[...] = acc[np_:].astype(ctx_ref.dtype)


def _kernel_context_concat(xf_ref, xc_ref, w_ref, b_ref,
                           logits_ref, ctx_ref, xcat_ref):
    # Large-channel path: concat into a VMEM scratch so the MXU sees the full
    # contraction depth (one matmul instead of two half-depth ones).
    np_ = logits_ref.shape[0]
    cf = xf_ref.shape[0]
    cc = xc_ref.shape[0]
    xcat_ref[0:cf, :] = xf_ref[...]
    xcat_ref[cf:cf + cc, :] = xc_ref[...]
    acc = jnp.dot(w_ref[...], xcat_ref[...], preferred_element_type=jnp.float32)
    acc = acc + b_ref[...]
    logits_ref[...] = acc[:np_].astype(logits_ref.dtype)
    ctx_ref[...] = acc[np_:].astype(ctx_ref.dtype)


# ----------------------------------------------------------------------------
# Tile / VMEM sizing helpers
# ----------------------------------------------------------------------------
def _round_down_128(n: int) -> int:
    return (n // 128) * 128


def _default_vmem_budget_bytes() -> int:
    """Conservative, generation-aware VMEM budget for the working set."""
    try:
        kind = jax.devices()[0].device_kind.lower()
    except Exception:
        return 24 << 20
    if "v5 lite" in kind or "v5e" in kind or "v5litepod" in kind:
        return 16 << 20          # lower HBM BW -> smaller tiles cost ~nothing
    return 24 << 20              # safe on v6e (128 MiB) and v7x (64 MiB)


def _choose_hw_tile(hw, bytes_per_lane, vmem_budget_bytes, weight_bytes,
                    target_max):
    """Largest lane-legal spatial tile that fits the VMEM budget."""
    usable = max(vmem_budget_bytes - weight_bytes, 0)
    cap = usable // max(bytes_per_lane, 1)
    thw = min(target_max, hw, max(cap, 128))
    if thw >= hw:
        return hw                # full extent: always a legal block shape
    return max(_round_down_128(thw), 128)


def _maybe_split_for_megacore(hw, thw, batch):
    """v7x has 2 TensorCores; keep the parallel grid at >= 2 points."""
    if batch > 1 or thw < hw:
        return thw
    half = _round_down_128((hw + 1) // 2)
    if 0 < half < hw:
        return half
    return thw


# ----------------------------------------------------------------------------
# Wrapper: 1x1 conv (+ fused concat & channel split) over NCHW inputs
# ----------------------------------------------------------------------------
def decoder_pointwise(features, context, wT, b2, *, num_prototypes,
                      compute_dtype=None, target_tile_hw=4096,
                      vmem_budget_bytes=None, concat_channel_threshold=256,
                      wT_split=None):
    """features: [B, C_feat, H, W]; context: [B, C_ctx, H, W] or None.

    wT: [C_out, C_in] (transposed 1x1 conv weight), b2: [C_out, 1].
    Returns (logits [B, NP, H, W], new_context [B, C_out - NP, H, W]).
    """
    B, C_feat, H, W = features.shape
    HW = H * W
    C_out, C_in = wT.shape
    NP = int(num_prototypes)
    C_ctx_out = C_out - NP
    # TODO(synk): degenerate case C_out == num_prototypes (empty new_context)
    # is not supported by this fused two-output kernel.
    assert C_ctx_out > 0, (C_out, NP)

    out_dtype = features.dtype
    cdt = jnp.dtype(compute_dtype) if compute_dtype is not None else jnp.dtype(out_dtype)

    has_ctx = context is not None
    xf = features.reshape(B, C_feat, HW).astype(cdt)
    if has_ctx:
        C_ctx = context.shape[1]
        assert C_feat + C_ctx == C_in, (C_feat, C_ctx, C_in)
        # .astype also unifies dtypes if features/context arrive mixed.
        xc = context.reshape(B, C_ctx, HW).astype(cdt)
    else:
        C_ctx = 0
        assert C_feat == C_in, (C_feat, C_in)

    wT = wT.astype(cdt)
    b2 = b2.astype(jnp.float32).reshape(C_out, 1)

    if vmem_budget_bytes is None:
        vmem_budget_bytes = _default_vmem_budget_bytes()

    isz = cdt.itemsize
    osz = jnp.dtype(out_dtype).itemsize
    use_concat = has_ctx and C_in >= concat_channel_threshold

    # Per-lane VMEM bytes: double-buffered inputs/outputs + f32 accumulator
    # (+ single-buffered concat scratch if used).
    bytes_per_lane = 2 * C_in * isz + 2 * C_out * osz + C_out * 4
    if use_concat:
        bytes_per_lane += C_in * isz
    weight_bytes = 2 * (C_in * C_out * isz + C_out * 4)

    thw = _choose_hw_tile(HW, bytes_per_lane, vmem_budget_bytes, weight_bytes,
                          target_tile_hw)
    thw = _maybe_split_for_megacore(HW, thw, B)
    n_hw = pl.cdiv(HW, thw)

    vmem_limit = int(min(max(weight_bytes + bytes_per_lane * thw + (4 << 20),
                             32 << 20), 128 << 20))

    cost = pl.CostEstimate(
        flops=int(2 * B * HW * C_in * C_out),
        transcendentals=0,
        bytes_accessed=int(B * HW * C_in * isz + B * HW * C_out * osz
                           + C_in * C_out * isz + C_out * 4),
    )

    def x_spec(c):
        return pl.BlockSpec((None, c, thw), lambda bi, j: (bi, 0, j))

    def const_spec(shape):
        return pl.BlockSpec(shape, lambda bi, j: (0,) * len(shape))

    out_shape = (
        jax.ShapeDtypeStruct((B, NP, HW), out_dtype),
        jax.ShapeDtypeStruct((B, C_ctx_out, HW), out_dtype),
    )
    out_specs = (
        pl.BlockSpec((None, NP, thw), lambda bi, j: (bi, 0, j)),
        pl.BlockSpec((None, C_ctx_out, thw), lambda bi, j: (bi, 0, j)),
    )

    scratch_shapes = ()
    if not has_ctx:
        kernel = _kernel_no_context
        in_specs = [x_spec(C_feat),
                    const_spec((C_out, C_in)), const_spec((C_out, 1))]
        args = (xf, wT, b2)
    elif use_concat:
        kernel = _kernel_context_concat
        in_specs = [x_spec(C_feat), x_spec(C_ctx),
                    const_spec((C_out, C_in)), const_spec((C_out, 1))]
        args = (xf, xc, wT, b2)
        scratch_shapes = (pltpu.VMEM((C_in, thw), cdt),)
    else:
        if wT_split is not None:
            wf, wc = wT_split
            wf, wc = wf.astype(cdt), wc.astype(cdt)
        else:
            wf, wc = wT[:, :C_feat], wT[:, C_feat:]
        kernel = _kernel_context_split
        in_specs = [x_spec(C_feat), x_spec(C_ctx),
                    const_spec((C_out, C_feat)), const_spec((C_out, C_ctx)),
                    const_spec((C_out, 1))]
        args = (xf, xc, wf, wc, b2)

    logits, new_ctx = pl.pallas_call(
        kernel,
        out_shape=out_shape,
        grid_spec=pltpu.PrefetchScalarGridSpec(
            num_scalar_prefetch=0,
            grid=(B, n_hw),
            in_specs=in_specs,
            out_specs=out_specs,
            scratch_shapes=scratch_shapes,
        ),
        compiler_params=pltpu.CompilerParams(
            dimension_semantics=("parallel", "parallel"),
            vmem_limit_bytes=vmem_limit),
        cost_estimate=cost,
    )(*args)

    return (logits.reshape(B, NP, H, W),
            new_ctx.reshape(B, C_ctx_out, H, W))


# ----------------------------------------------------------------------------
# Decoder (JAX / Pallas)
# ----------------------------------------------------------------------------
class Decoder:
    """JAX mirror of kornia.feature.dedode.decoder.Decoder.

    `layers` maps scale -> (weight [C_in, C_out], bias [C_out]) for the 1x1
    conv channel-mixing hot path (the reference types the layer as `Any`).
    Weight transpose / bias reshape / channel splits are done once at init
    (or cached), not per forward call.
    """

    def __init__(self, layers, *, super_resolution: bool = False,
                 num_prototypes: int = 1, compute_dtype=None):
        self.super_resolution = super_resolution
        self.num_prototypes = num_prototypes
        self.compute_dtype = compute_dtype
        self.layers = {}
        for scale, (w, b) in layers.items():
            wT = jnp.asarray(w).T                       # (C_out, C_in), once
            if compute_dtype is not None:
                wT = wT.astype(compute_dtype)
            b2 = jnp.asarray(b, jnp.float32).reshape(-1, 1)
            self.layers[scale] = (wT, b2)
        self.scales = self.layers.keys()
        self._split_cache = {}

    def _split(self, scale, c_feat):
        key = (scale, c_feat)
        if key not in self._split_cache:
            wT, _ = self.layers[scale]
            self._split_cache[key] = (wT[:, :c_feat], wT[:, c_feat:])
        return self._split_cache[key]

    def __call__(self, features, context=None, scale=None):
        wT, b2 = self.layers[scale]
        split = (self._split(scale, features.shape[1])
                 if context is not None else None)
        return decoder_pointwise(
            features, context, wT, b2,
            num_prototypes=self.num_prototypes,
            compute_dtype=self.compute_dtype,
            wT_split=split)


# ----------------------------------------------------------------------------
# Deterministic parameter construction + smoke test
# ----------------------------------------------------------------------------
def _make_layer_params(key, c_in, c_out, dtype=jnp.float32):
    kw, kb = jax.random.split(key)
    w = jax.random.normal(kw, (c_in, c_out), dtype) * (1.0 / jnp.sqrt(c_in))
    b = jax.random.normal(kb, (c_out,), dtype) * 0.01
    return w, b


if __name__ == "__main__":
    key = jax.random.PRNGKey(0)
    k_feat, k_ctx, k_layer8, k_layer4 = jax.random.split(key, 4)

    # Small shapes: batch=2, feature channels=4, context channels=4, 16x16.
    B, C_feat, C_ctx, H, W = 2, 4, 4, 16, 16
    num_prototypes = 1
    C_out = num_prototypes + 31     # layer emits num_prototypes + 31 = 32 ch

    layers = {
        8: _make_layer_params(k_layer8, C_feat + C_ctx, C_out),  # with context
        4: _make_layer_params(k_layer4, C_feat, C_out),          # no context
    }
    decoder = Decoder(layers, num_prototypes=num_prototypes)

    features = jax.random.normal(k_feat, (B, C_feat, H, W), jnp.float32)
    context = jax.random.normal(k_ctx, (B, C_ctx, H, W), jnp.float32)

    # References.
    w8, b8 = layers[8]
    x_cat = jnp.concatenate((features, context), axis=1)
    ref8 = jnp.einsum("bchw,co->bohw", x_cat, w8) + b8[None, :, None, None]
    w4, b4 = layers[4]
    ref4 = jnp.einsum("bchw,co->bohw", features, w4) + b4[None, :, None, None]

    # --- scale 8: features + context (fused concat, split-W path) ------------
    logits, new_context = decoder(features, context=context, scale=8)
    jax.block_until_ready((logits, new_context))
    assert logits.shape == (B, num_prototypes, H, W), logits.shape
    assert new_context.shape == (B, C_out - num_prototypes, H, W)
    assert jnp.allclose(logits, ref8[:, :num_prototypes], atol=2e-5, rtol=2e-5)
    assert jnp.allclose(new_context, ref8[:, num_prototypes:], atol=2e-5, rtol=2e-5)

    # --- scale 4: features only (context=None path) ---------------------------
    logits4, ctx4 = decoder(features, context=None, scale=4)
    jax.block_until_ready((logits4, ctx4))
    assert jnp.allclose(logits4, ref4[:, :num_prototypes], atol=2e-5, rtol=2e-5)
    assert jnp.allclose(ctx4, ref4[:, num_prototypes:], atol=2e-5, rtol=2e-5)

    # --- concat-scratch kernel path (forced at small channel counts) ----------
    wT8, b8_2 = decoder.layers[8]
    lg_c, cx_c = decoder_pointwise(
        features, context, wT8, b8_2, num_prototypes=num_prototypes,
        concat_channel_threshold=0)
    jax.block_until_ready((lg_c, cx_c))
    assert jnp.allclose(lg_c, ref8[:, :num_prototypes], atol=2e-5, rtol=2e-5)
    assert jnp.allclose(cx_c, ref8[:, num_prototypes:], atol=2e-5, rtol=2e-5)

    # --- bf16 I/O path (accuracy-approved option: halves HBM traffic) ---------
    decoder_bf16 = Decoder(layers, num_prototypes=num_prototypes,
                           compute_dtype=jnp.bfloat16)
    lg_b, cx_b = decoder_bf16(features, context=context, scale=8)
    jax.block_until_ready((lg_b, cx_b))
    assert jnp.allclose(lg_b, ref8[:, :num_prototypes], atol=5e-2, rtol=5e-2)
    assert jnp.allclose(cx_b, ref8[:, num_prototypes:], atol=5e-2, rtol=5e-2)

    print("KERNEL_OK")
</pallas_src>

<mosaic_0001>
module attributes {stable_mosaic.version = 11 : i64} {
  func.func @_kernel_context_split(%arg0: i32, %arg1: i32, %arg2: memref<1x4x256xf32, #tpu.memory_space<vmem>>, %arg3: memref<1x4x256xf32, #tpu.memory_space<vmem>>, %arg4: memref<32x4xf32, #tpu.memory_space<vmem>>, %arg5: memref<32x4xf32, #tpu.memory_space<vmem>>, %arg6: memref<32x1xf32, #tpu.memory_space<vmem>>, %arg7: memref<1x1x256xf32, #tpu.memory_space<vmem>>, %arg8: memref<1x31x256xf32, #tpu.memory_space<vmem>>) attributes {dimension_semantics = [#tpu.dimension_semantics<parallel>, #tpu.dimension_semantics<parallel>], iteration_bounds = array<i64: 2, 1>, scalar_prefetch = 0 : i64, scratch_operands = 0 : i64, tpu.core_type = #tpu.core_type<tc>, window_params = [{transform_indices = @transform_0, window_bounds = array<i64: 1, 4, 256>}, {transform_indices = @transform_1, window_bounds = array<i64: 1, 4, 256>}, {pipeline_mode = #tpu.pipeline_mode<synchronous>, transform_indices = @transform_2, window_bounds = array<i64: 32, 4>}, {pipeline_mode = #tpu.pipeline_mode<synchronous>, transform_indices = @transform_3, window_bounds = array<i64: 32, 4>}, {pipeline_mode = #tpu.pipeline_mode<synchronous>, transform_indices = @transform_4, window_bounds = array<i64: 32, 1>}, {transform_indices = @transform_5, window_bounds = array<i64: 1, 1, 256>}, {transform_indices = @transform_6, window_bounds = array<i64: 1, 31, 256>}]} {
    %c0 = arith.constant 0 : index
    %c0_0 = arith.constant 0 : index
    %0 = vector.load %arg4[%c0, %c0_0] : memref<32x4xf32, #tpu.memory_space<vmem>>, vector<32x4xf32>
    %c0_1 = arith.constant 0 : index
    %c0_2 = arith.constant 0 : index
    %c0_3 = arith.constant 0 : index
    %1 = vector.load %arg2[%c0_1, %c0_2, %c0_3] : memref<1x4x256xf32, #tpu.memory_space<vmem>>, vector<1x4x256xf32>
    %2 = vector.shape_cast %1 : vector<1x4x256xf32> to vector<4x256xf32>
    %cst = arith.constant dense<0.000000e+00> : vector<32x256xf32>
    %3 = tpu.matmul %0, %2, %cst {dimension_numbers = #tpu.dot_dimension_numbers<[1], [0], [0], [1], [0, 0, 1, 1], [], []>} : vector<32x4xf32>, vector<4x256xf32>, vector<32x256xf32> -> vector<32x256xf32>
    %c0_4 = arith.constant 0 : index
    %c0_5 = arith.constant 0 : index
    %4 = vector.load %arg5[%c0_4, %c0_5] : memref<32x4xf32, #tpu.memory_space<vmem>>, vector<32x4xf32>
    %c0_6 = arith.constant 0 : index
    %c0_7 = arith.constant 0 : index
    %c0_8 = arith.constant 0 : index
    %5 = vector.load %arg3[%c0_6, %c0_7, %c0_8] : memref<1x4x256xf32, #tpu.memory_space<vmem>>, vector<1x4x256xf32>
    %6 = vector.shape_cast %5 : vector<1x4x256xf32> to vector<4x256xf32>
    %cst_9 = arith.constant dense<0.000000e+00> : vector<32x256xf32>
    %7 = tpu.matmul %4, %6, %cst_9 {dimension_numbers = #tpu.dot_dimension_numbers<[1], [0], [0], [1], [0, 0, 1, 1], [], []>} : vector<32x4xf32>, vector<4x256xf32>, vector<32x256xf32> -> vector<32x256xf32>
    %8 = arith.addf %3, %7 : vector<32x256xf32>
    %c0_10 = arith.constant 0 : index
    %c0_11 = arith.constant 0 : index
    %9 = vector.load %arg6[%c0_10, %c0_11] : memref<32x1xf32, #tpu.memory_space<vmem>>, vector<32x1xf32>
    %10 = vector.broadcast %9 : vector<32x1xf32> to vector<32x256xf32>
    %11 = arith.addf %8, %10 : vector<32x256xf32>
    %12 = vector.extract_strided_slice %11 {offsets = [0, 0], sizes = [1, 256], strides = [1, 1]} : vector<32x256xf32> to vector<1x256xf32>
    %c0_12 = arith.constant 0 : index
    %c0_13 = arith.constant 0 : index
    %c0_14 = arith.constant 0 : index
    %13 = vector.load %arg7[%c0_12, %c0_13, %c0_14] : memref<1x1x256xf32, #tpu.memory_space<vmem>>, vector<1x1x256xf32>
    %14 = vector.shape_cast %13 : vector<1x1x256xf32> to vector<1x256xf32>
    %15 = vector.shape_cast %12 : vector<1x256xf32> to vector<1x1x256xf32>
    tpu.vector_store %arg7[%c0_12, %c0_13, %c0_14], %15 {strides = array<i32>} : memref<1x1x256xf32, #tpu.memory_space<vmem>>, vector<1x1x256xf32>,
    %16 = vector.extract_strided_slice %11 {offsets = [1, 0], sizes = [31, 256], strides = [1, 1]} : vector<32x256xf32> to vector<31x256xf32>
    %c0_15 = arith.constant 0 : index
    %c0_16 = arith.constant 0 : index
    %c0_17 = arith.constant 0 : index
    %17 = vector.load %arg8[%c0_15, %c0_16, %c0_17] : memref<1x31x256xf32, #tpu.memory_space<vmem>>, vector<1x31x256xf32>
    %18 = vector.shape_cast %17 : vector<1x31x256xf32> to vector<31x256xf32>
    %19 = vector.shape_cast %16 : vector<31x256xf32> to vector<1x31x256xf32>
    tpu.vector_store %arg8[%c0_15, %c0_16, %c0_17], %19 {strides = array<i32>} : memref<1x31x256xf32, #tpu.memory_space<vmem>>, vector<1x31x256xf32>,
    return
  }
  func.func @transform_0(%arg0: i32, %arg1: i32) -> (i32, i32, i32) {
    %c0_i32 = arith.constant 0 : i32
    %c0_i32_0 = arith.constant 0 : i32
    return %arg0, %c0_i32, %arg1 : i32, i32, i32
  }
  func.func @transform_1(%arg0: i32, %arg1: i32) -> (i32, i32, i32) {
    %c0_i32 = arith.constant 0 : i32
    %c0_i32_0 = arith.constant 0 : i32
    return %arg0, %c0_i32, %arg1 : i32, i32, i32
  }
  func.func @transform_2(%arg0: i32, %arg1: i32) -> (i32, i32) {
    %c0_i32 = arith.constant 0 : i32
    %c0_i32_0 = arith.constant 0 : i32
    %c0_i32_1 = arith.constant 0 : i32
    return %c0_i32, %c0_i32_0 : i32, i32
  }
  func.func @transform_3(%arg0: i32, %arg1: i32) -> (i32, i32) {
    %c0_i32 = arith.constant 0 : i32
    %c0_i32_0 = arith.constant 0 : i32
    %c0_i32_1 = arith.constant 0 : i32
    return %c0_i32, %c0_i32_0 : i32, i32
  }
  func.func @transform_4(%arg0: i32, %arg1: i32) -> (i32, i32) {
    %c0_i32 = arith.constant 0 : i32
    %c0_i32_0 = arith.constant 0 : i32
    %c0_i32_1 = arith.constant 0 : i32
    return %c0_i32, %c0_i32_0 : i32, i32
  }
  func.func @transform_5(%arg0: i32, %arg1: i32) -> (i32, i32, i32) {
    %c0_i32 = arith.constant 0 : i32
    %c0_i32_0 = arith.constant 0 : i32
    return %arg0, %c0_i32, %arg1 : i32, i32, i32
  }
  func.func @transform_6(%arg0: i32, %arg1: i32) -> (i32, i32, i32) {
    %c0_i32 = arith.constant 0 : i32
    %c0_i32_0 = arith.constant 0 : i32
    return %arg0, %c0_i32, %arg1 : i32, i32, i32
  }
}

</mosaic_0001>

<bundles_post_ra>
// kernel: tpu_custom_call.1
= control target key start
LH: loop header
LB: loop body
LE: loop exit
PB: predicated region body
PF: predicated region fallthrough
CT: control target
= control target key end

     0   :  { %12 = vsyncpa [#allocation3], 0  ;;  %s1237_s0 = inlined_call_operand.vmem [shape: f32[2,4,256], index: 0, kind: input, shape index: {}]   ;;  %s1238_s1 = inlined_call_operand.vmem [shape: f32[2,4,256], index: 1, kind: input, shape index: {}]   ;;  %s1239_s2 = inlined_call_operand.vmem [shape: f32[32,4], index: 2, kind: input, shape index: {}]   ;;  %s1240_s3 = inlined_call_operand.vmem [shape: f32[32,4], index: 3, kind: input, shape index: {}]   ;;  %s1241_s4 = inlined_call_operand.vmem [shape: f32[32,1], index: 4, kind: input, shape index: {}]   ;;  %s1242_s5 = inlined_call_operand.hbm [shape: f32[2,1,256], index: 5, kind: output, shape index: {0}]   ;;  %s1243_s6 = inlined_call_operand.vmem [shape: f32[2,31,256], index: 6, kind: output, shape index: {1}]  }
   0x1   :  { %14 = vsyncpa [#allocation3 + $0x1], 0  ;;  %s1042_s21 = smov 0   ;;  %s1044_s22 = smov 0  }
   0x2   :  { %s1046_s23 = smov 0   ;;  %s1048_s24 = smov 0  }
   0x3   :  { %s1050_s25 = smov 0   ;;  %s1052_s26 = smov 0  }
   0x4 LB: > { %s820_s27 = sadd.s32 4294967295, %s1001_s26   ;;  %s821_s28 = sadd.s32 4294967294, %s1001_s26   ;;  %s1001_s26 = sphi %s1052_s26, %s20_s26   ;;  %s997_s25 = sphi %s1050_s25, %s1250_s25   ;;  %s993_s24 = sphi %s1048_s24, %s1249_s24   ;;  %s989_s23 = sphi %s1046_s23, %s1248_s23   ;;  %s985_s22 = sphi %s1044_s22, %s1247_s22   ;;  %s981_s21 = sphi %s1042_s21, %s1246_s21  }
   0x5   : > { %s32_s29 = sadd.s32 1, %s997_s25  ;;  %s160_s30 = sadd.s32 1, %s989_s23 }
   0x6   : > { %p34_p0 = scmp.ge.s32.totalorder %s32_s29, 2  ;;  %p170_p1 = scmp.ne.s32.totalorder %s989_s23, %s985_s22 }
   0x7   : > { %p171_p2 = scmp.eq.s32.totalorder %s820_s27, 1  ;;  %p176_p3 = scmp.ne.s32.totalorder %s985_s22, %s981_s21 }
   0x8   : > { %s1252_s29 = smov (%p34_p0, %s32_s29), 0  ;;  %p177_p5 = scmp.eq.s32.totalorder %s821_s28, 1 }
   0x9   : > { %p1082_p4 = por %p171_p2, %p170_p1  ;;  %s155_s8 = ssub.s32 %s997_s25, %s1252_s29 }
   0xa   : > { %p824_p6 = scmp.ge.s32.totalorder %s1001_s26, 1  ;;  %p158_p7 = scmp.eq.s32.totalorder %s155_s8, 0 }
   0xb   : > { %p1089_p8 = por %p177_p5, %p176_p3  ;;  %p258_p9 = scmp.lt.s32.totalorder %s1001_s26, 3 }
   0xc   : > { %s1095_s10 = scalar_select %p158_p7, %s989_s23, %s160_s30  }
   0xd   : > { %p259_p10 = pnand %p824_p6, %p258_p9 }
   0xe   : > { %p311_p11 = scmp.lt.s32.totalorder (!%p259_p10), %s993_s24, 1  ;;  %v1003_v0 = vmov (!%p259_p10), 0.0   ;;  %v1004_v1 = vmov (!%p259_p10), 0   ;;  %v567_v2 = vld [vmem:[%s1241_s4] sm:$0xff] (!%p259_p10)  ;;  %v569_v3 = vld [vmem:[%s1241_s4 + $0x10] sm:$0xff] (!%p259_p10)  ;;  %v568_v4 = vld [vmem:[%s1241_s4 + $0x8] sm:$0xff] (!%p259_p10)  ;;  %v605_v20 = vlaneseq (!%p259_p10) }
   0xf   : > { %262 = sbr.rel (%p259_p10) target bundleno = 277 (0x115), region = 40  ;;  %435 = vmatprep.mubr.f32.mxu1 (!%p259_p10), %v1003_v0  ;;  %542 = vmatprep.mubr.f32.mxu0 (!%p259_p10), %v1003_v0  ;;  %v570_v5 = vld [vmem:[%s1241_s4 + $0x18] sm:$0xff] (!%p259_p10)  ;;  %vm366_vm0 = vcmask (!%p259_p10), 1043456   ;;  %v346_v10 = vld [vmem:[%s1240_s3] sm:$0xff] (!%p259_p10)  ;;  %vm353_vm1 = vcmask (!%p259_p10), 31744   ;;  %v347_v12 = vld [vmem:[%s1240_s3 + $0x8] sm:$0xff] (!%p259_p10) }
  0x10   : > { %919 = vset.pattern.permute.xlu0 (!%p259_p10), %v1004_v1  ;;  %920 = vset.pattern.permute.xlu1 (!%p259_p10), %v1004_v1  ;;  %v341_v11 = vld [vmem:[%s1239_s2] sm:$0xff] (!%p259_p10)  ;;  %v342_v13 = vld [vmem:[%s1239_s2 + $0x8] sm:$0xff] (!%p259_p10)  ;;  %v348_v14 = vld [vmem:[%s1240_s3 + $0x10] sm:$0xff] (!%p259_p10)  ;;  %v1005_v18 = vmov (!%p259_p10), 1966171168   ;;  %v606_v26 = vshrl.u32 (!%p259_p10), %v605_v20, 7 }
  0x11   : > { %573 = vperm.xlu0 (!%p259_p10), %919, %v567_v2   ;;  %583 = vperm.xlu1 (!%p259_p10), %920, %v569_v3   ;;  %v343_v15 = vld [vmem:[%s1239_s2 + $0x10] sm:$0xff] (!%p259_p10)  ;;  %v349_v16 = vld [vmem:[%s1240_s3 + $0x18] sm:$0xff] (!%p259_p10)  ;;  %v603_v19 = vunpack.c.l.s4 (!%p259_p10), %v1005_v18  ;;  %s296_s18 = sand.u32 (!%p259_p10), 1, %s985_s22   ;;  %s852_s20 = sshll.u32 (!%p259_p10), %s993_s24, 5  ;;  %vm628_vm2 = vcmask (!%p259_p10), 1046528   ;;  %vm619_vm3 = vcmp.lt.s32.totalorder (!%p259_p10), %v605_v20, 256 }
  0x12   : > { %v344_v17 = vld [vmem:[%s1239_s2 + $0x18] sm:$0xff] (!%p259_p10)  ;;  %s660_s14 = scalar_lea.sflag (!%p259_p10), [#allocation3], %s296_s18  ;;  %s1006_s17 = smov (!%p259_p10), [#allocation2]  }
  0x13   : > { %v604_v25 = vunpack.c.0.s8 (!%p259_p10), %v603_v19 }
  0x15   : > { %578 = vperm.xlu0 (!%p259_p10), %919, %v568_v4   ;;  %588 = vperm.xlu1 (!%p259_p10), %920, %v570_v5   ;;  %v607_v33 = vsub.s32 (!%p259_p10), %v604_v25, %v606_v26 }
  0x16   : > { %s1099_s11 = scalar_select %p311_p11, %s993_s24, 1 }
  0x18   : > { %s849_s16 = sshll.u32 %s1099_s11, 3 }
  0x19   : > { %s328_s19 = scalar_lea.vmem %s1238_s1, %s849_s16  ;;  %s318_s13 = scalar_lea.vmem %s1237_s0, %s849_s16 }
  0x1a   : > { %v350_v6 = vld [vmem:[%s328_s19] sm:$0xff]  ;;  %s1155_s16 = sshll.u32 %s296_s18, 1  ;;  %s851_s19 = sshll.u32 %s1099_s11, 6 }
  0x1b   : > { %v352_v7 = vcombine.high %v350_v6, %v350_v6  ;;  %v345_v8 = vld [vmem:[%s318_s13] sm:$0xff]  ;;  %s298_s27 = scalar_lea.vmem [#allocation2], %s1155_s16  ;;  %s1167_s12 = scalar_lea.vmem %s1243_s6, %s851_s19 }
  0x1c   : > { %v461_v9 = vcombine.high %v345_v8, %v345_v8  ;;  %s685_s28 = sshll.u32 %s298_s27, 4  ;;  %s1174_s13 = scalar_lea.hbm %s1242_s5, %s852_s20  ;;  %s1176_s28 = int_to_ptr.vmem [resolvable:$true] %s685_s28 }
  0x1d   : > { %832 = vmatprep.subr.msk.mxu1 %vm366_vm0, %v352_v7  ;;  %s923_s15 = scalar_lea.vmem %s1176_s28, 32  ;;  %s927_s16 = sshll.u32 %s1006_s17, 4  ;;  %s928_s16 = int_to_ptr.vmem [resolvable:$false] %s927_s16 }
  0x1e   : > { %838 = vmatprep.subr.msk.mxu0 %vm366_vm0, %v461_v9  ;;  %833 = vmatpush1.msk.msra.mxu1 %vm366_vm0, %v350_v6  ;;  %p924_p12 = scmp.ne.s32.totalorder %s1176_s28, %s923_s15  ;;  %s929_s19 = scalar_lea.vmem %s928_s16, 64 }
  0x1f   : > { %839 = vmatpush1.msk.msra.mxu0 %vm366_vm0, %v345_v8  ;;  %834 = vmatmul.mubr.msk.f32.vlgmr.msra.gmra.mrb[0].mxu1 %vm353_vm1, %v346_v10  ;;  %p930_p1 = scmp.lt.s32.totalorder %s1176_s28, %s928_s16  ;;  %p931_p2 = scmp.lt.s32.totalorder %s929_s19, %s923_s15 }
  0x20   : > { %840 = vmatmul.mubr.msk.f32.vlgmr.msra.gmra.mrb[0].mxu0 %vm353_vm1, %v341_v11  ;;  %441 = vmatprep.mubr.f32.mxu1 %v1003_v0  ;;  %p925_p13 = pnand %p924_p12, %p1082_p4 }
  0x21   : > { %548 = vmatprep.mubr.f32.mxu0 %v1003_v0  ;;  %p932_p3 = por %p931_p2, %p930_p1 }
  0x22   : > { %p926_p0 = pneg %p925_p13 }
  0x23   : > { %835 = vmatmul.mubr.msk.f32.gmra.mrb[2].mxu1 %vm353_vm1, %v347_v12 }
  0x24   : > { %841 = vmatmul.mubr.msk.f32.gmra.mrb[2].mxu0 %vm353_vm1, %v342_v13  ;;  %447 = vmatprep.mubr.f32.mxu1 %v1003_v0  ;;  %p933_p5 = pnand %p932_p3, %p926_p0 }
  0x25   : > { %554 = vmatprep.mubr.f32.mxu0 %v1003_v0 }
  0x27   : > { %836 = vmatmul.mubr.msk.f32.gmra.mrb[4].mxu1 %vm353_vm1, %v348_v14 }
  0x28   : > { %842 = vmatmul.mubr.msk.f32.gmra.mrb[4].mxu0 %vm353_vm1, %v343_v15  ;;  %453 = vmatprep.mubr.f32.mxu1 %v1003_v0 }
  0x29   : > { %560 = vmatprep.mubr.f32.mxu0 %v1003_v0 }
  0x2b   : > { %837 = vmatmul.mubr.msk.f32.gmra.mrb[6].mxu1 %vm353_vm1, %v349_v16 }
  0x2c   : > { %843 = vmatmul.mubr.msk.f32.gmra.mrb[6].mxu0 %vm353_vm1, %v344_v17 }
  0x90   : > { %v574_v21 = vpop.permute.xlu0 %573  ;;  %v584_v42 = vpop.permute.xlu1 %583 }
  0x94   : > { %v579_v32 = vpop.permute.xlu0 %578 }
  0xf2   : > { %v437_v22 = vpop.f32.mrb[0].mxu1 }
  0xf3   : > { %v544_v23 = vpop.f32.mrb[0].mxu0  ;;  %v439_v24 = vpop.f32.mrb[1].mxu1 }
  0xf4   : > { %v545_v27 = vadd.f32 %v544_v23, %v437_v22  ;;  %v546_v28 = vpop.f32.mrb[1].mxu0 }
  0xf5   : > { %v547_v29 = vadd.f32 %v546_v28, %v439_v24 }
  0xf6   : > { %v591_v30 = vadd.f32 %v574_v21, %v545_v27  ;;  %v443_v31 = vpop.f32.mrb[2].mxu1 }
  0xf7   : > { %v592_v34 = vadd.f32 %v574_v21, %v547_v29  ;;  %v550_v35 = vpop.f32.mrb[2].mxu0  ;;  %v445_v36 = vpop.f32.mrb[3].mxu1 }
  0xf8   : > { %v551_v37 = vadd.f32 %v550_v35, %v443_v31  ;;  %v552_v38 = vpop.f32.mrb[3].mxu0  ;;  %v629_v48 = vrot.slane %v591_v30, 1 }
  0xf9   : > { %v601_v39 = vcombine.low %v591_v30, %v592_v34  ;;  %v553_v40 = vadd.f32 %v552_v38, %v445_v36  ;;  %v632_v53 = vrot.slane %v592_v34, 1 }
  0xfa   : > { %v1158_v41 = vadd.f32 %v579_v32, %v551_v37  ;;  %v449_v43 = vpop.f32.mrb[4].mxu1 }
  0xfb   : > { %v608_v44 = vrot.slane %v601_v39, %v607_v33  ;;  %v1162_v45 = vadd.f32 %v579_v32, %v553_v40  ;;  %v556_v46 = vpop.f32.mrb[4].mxu0  ;;  %v451_v47 = vpop.f32.mrb[5].mxu1 }
  0xfc   : > { %v630_v49 = vrot.slane %v1158_v41, 1  ;;  %v557_v50 = vadd.f32 %v556_v46, %v449_v43  ;;  %v558_v51 = vpop.f32.mrb[5].mxu0 }
  0xfd   : > { %v615_v52 = vrot.slane %v608_v44, %v607_v33  ;;  %v633_v54 = vrot.slane %v1162_v45, 1  ;;  %v559_v55 = vadd.f32 %v558_v51, %v451_v47 }
  0xfe   : > { %v631_v56 = vsel %vm628_vm2, %v629_v48, %v630_v49  ;;  %v595_v57 = vadd.f32 %v584_v42, %v557_v50  ;;  %v455_v58 = vpop.f32.mrb[6].mxu1 }
  0xff   : > { %v634_v59 = vsel %vm628_vm2, %v632_v53, %v633_v54  ;;  %651 = vst [vmem:[%s1167_s12] sm:$0xff] %v631_v56  ;;  %v596_v60 = vadd.f32 %v584_v42, %v559_v55  ;;  %v562_v61 = vpop.f32.mrb[6].mxu0  ;;  %v457_v62 = vpop.f32.mrb[7].mxu1  ;;  %621 = vst.msk [vmem:[%s298_s27] sm:$0x3] %vm619_vm3, %v615_v52 }
 0x100   : > { %652 = vst [vmem:[%s1167_s12 + $0x8] sm:$0xff] %v634_v59  ;;  %v635_v63 = vrot.slane %v595_v57, 1  ;;  %v563_v0 = vadd.f32 %v562_v61, %v455_v58  ;;  %v564_v1 = vpop.f32.mrb[7].mxu0 }
 0x101   : > { %936 = shalt.err (!%p933_p5)
}
 0x102   : > { %s937_s18 = scalar_lea.hbm %s1174_s13, 32  ;;  %s941_s30 = scalar_lea.hbm %s1242_s5, 64 }
 0x103   : > { %p938_p6 = scmp.ne.s32.totalorder %s1174_s13, %s937_s18  ;;  %p942_p10 = scmp.lt.u32.totalorder %s1174_s13, %s1242_s5 }
 0x104   : > { %p943_p11 = scmp.lt.u32.totalorder %s941_s30, %s937_s18  ;;  %p945_p13 = scmp.lt.u32.totalorder %s937_s18, %s1174_s13 }
 0x105   : > { %p939_p7 = pnand %p938_p6, %p1082_p4 }
 0x106   : > { %p944_p12 = por %p943_p11, %p942_p10 }
 0x107   : > { %p940_p9 = pneg %p939_p7 }
 0x108   : > { %p946_p0 = por %p945_p13, %p944_p12 }
 0x10a   : > { %p947_p1 = pnand %p946_p0, %p940_p9 }
 0x10c   : > { %950 = shalt.err (!%p947_p1)
}
 0x10d   : > { %861 = dma.vmem_to_hbm [thread:$0]  (%p1082_p4), %s1176_s28, 32, %s1174_s13, %s660_s14   ;;  %v637_v2 = vrot.slane %v596_v60, 1  ;;  %v589_v3 = vpop.permute.xlu1 %588  ;;  %v565_v4 = vadd.f32 %v564_v1, %v457_v62  ;;  %v636_v5 = vsel %vm628_vm2, %v630_v49, %v635_v63 }
 0x10e   : > { %v597_v6 = vadd.f32 %v589_v3, %v563_v0  ;;  %653 = vst [vmem:[%s1167_s12 + $0x10] sm:$0xff] %v636_v5 }
 0x10f   : > { %v638_v7 = vsel %vm628_vm2, %v633_v54, %v637_v2  ;;  %v598_v8 = vadd.f32 %v589_v3, %v565_v4 }
 0x110   : > { %654 = vst [vmem:[%s1167_s12 + $0x18] sm:$0xff] %v638_v7  ;;  %v639_v9 = vrot.slane %v597_v6, 1 }
 0x111   : > { %v641_v10 = vrot.slane %v598_v8, 1 }
 0x112   : > { %v640_v11 = vsel %vm628_vm2, %v635_v63, %v639_v9  ;;  %657 = vst [vmem:[%s1167_s12 + $0x30] sm:$0x7f] %v639_v9 }
 0x113   : > { %655 = vst [vmem:[%s1167_s12 + $0x20] sm:$0xff] %v640_v11  ;;  %v642_v12 = vsel %vm628_vm2, %v637_v2, %v641_v10  ;;  %658 = vst [vmem:[%s1167_s12 + $0x38] sm:$0x7f] %v641_v10 }
 0x114   : > { %656 = vst [vmem:[%s1167_s12 + $0x28] sm:$0xff] %v642_v12 }
 0x115 PF: > { %p867_p4 = scmp.ge.s32.totalorder %s1001_s26, 2  ;;  %s701_s7 = sand.u32 1, %s981_s21  }
 0x116   : > { %s702_s28 = scalar_lea.sflag [#allocation3], %s701_s7 }
 0x117   : > { %p864_p2 = pnand %p867_p4, %p1089_p8 }
 0x119   : > { %976 = dma.done.wait (!%p864_p2), %s702_s28, 32  }
 0x11a   : > { %978 = vsyncadd (!%p864_p2), %s702_s28, 4294967264  ;;  %s20_s26 = sadd.s32 1, %s1001_s26   ;;  %s1246_s21 = smov %s985_s22 }
 0x11b   : > { %p17_p3 = scmp.ge.s32.totalorder %s20_s26, 4   ;;  %s1247_s22 = smov %s989_s23 }
 0x11c   : > { %s1248_s23 = smov %s1095_s10  ;;  %s1249_s24 = smov %s997_s25 }
 0x11d   : > { %s1250_s25 = smov %s1252_s29  ;;  %19 = sbr.rel (!%p17_p3) target bundleno = 4 (0x4), region = 90 }
 0x124   :  { %719 = vsyncpa [#allocation3], 1 }
 0x125   :  { %721 = vsyncpa [#allocation3 + $0x1], 1 }

</bundles_post_ra>
